<compile_context>
chip_gen: v6e
topology: v6e:2x2x1
jax: 0.10.0
libtpu: 0.0.40
codegen_flags: <defaults>
</compile_context>

<pallas_src>
import functools

import jax
import jax.numpy as jnp
from jax.experimental import pallas as pl
from jax.experimental.pallas import tpu as pltpu

_LANES = 128


def _bce_loss_expr(z, t):
    # Exactly the PyTorch formula: z.clamp(min=0) - z*t + log(1 + exp(-|z|)).
    return jnp.maximum(z, 0.0) - z * t + jnp.log(1.0 + jnp.exp(-jnp.abs(z)))


def _bce_kernel(z_ref, t_ref, out_ref, acc_ref, *, valid_rows, n_blocks,
                g_inner, tile_rows, lanes, tail_mask, overshoot_guard):
    o = pl.program_id(0)   # parallel outer axis (megacore-shardable)
    i = pl.program_id(1)   # arbitrary inner (reduction) axis

    @pl.when(i == 0)
    def _():
        acc_ref[...] = jnp.zeros_like(acc_ref)

    row_block = o * g_inner + i

    def accumulate():
        z = z_ref[...].astype(jnp.float32)     # (tile_rows, lanes)
        t = t_ref[...].astype(jnp.float32)
        loss = _bce_loss_expr(z, t)

        def add(l):
            # Reduce-then-accumulate: one (8, lanes) vreg of VMEM traffic per
            # step instead of a full-width accumulator.
            acc_ref[...] += l.reshape(-1, 8, lanes).sum(axis=0)

        if tail_mask:
            # Only the final live block can contain rows past valid_rows
            # (partial-block garbage may be Inf/NaN -> must use a select).
            @pl.when(row_block == n_blocks - 1)
            def _():
                row_ids = (jax.lax.broadcasted_iota(
                    jnp.int32, (tile_rows, lanes), 0)
                    + (n_blocks - 1) * tile_rows)
                add(jnp.where(row_ids < valid_rows, loss, 0.0))

            @pl.when(row_block < n_blocks - 1)
            def _():
                add(loss)
        else:
            add(loss)

    if overshoot_guard:
        # Skip the (at most one) overshoot block created to keep g_outer >= 2.
        pl.when(row_block < n_blocks)(accumulate)
    else:
        accumulate()

    @pl.when(i == pl.num_programs(1) - 1)
    def _():
        out_ref[0] = acc_ref[...]


def _sublane_multiple(x):
    # f32 -> 8, bf16/f16 -> 16, int8/bool/fp8 -> 32 (native TPU tiling).
    itemsize = jnp.dtype(x.dtype).itemsize
    return 8 * max(1, 4 // max(1, itemsize))


def pseudo_bce_loss_2d(logit, truth, *, tile_rows=8192, max_outer=8):
    """Forward of PseudoBCELoss2d: mean over all elements of the stable BCE loss."""
    assert logit.shape == truth.shape, (logit.shape, truth.shape)
    total = int(logit.size)

    z_flat = logit.reshape(-1)          # keep native dtypes; cast per tile
    t_flat = truth.reshape(-1)

    rows = total // _LANES
    rem = total - rows * _LANES

    # <128-element remainder: plain JAX (no whole-array pad, no pad-value hazard).
    tail = jnp.float32(0.0)
    if rem:
        zt = z_flat[rows * _LANES:].astype(jnp.float32)
        tt = t_flat[rows * _LANES:].astype(jnp.float32)
        tail = jnp.sum(_bce_loss_expr(zt, tt))

    m = max(_sublane_multiple(logit), _sublane_multiple(truth))

    if rows < m:
        # Too small for a legal TPU tile: tiny input, pure-JAX fallback.
        body = jnp.float32(0.0)
        if rows:
            zb = z_flat[:rows * _LANES].astype(jnp.float32)
            tb = t_flat[:rows * _LANES].astype(jnp.float32)
            body = jnp.sum(_bce_loss_expr(zb, tb))
        return (body + tail) / jnp.float32(total)

    if rem:
        # TODO(synk): this prefix slice may still force XLA to materialize a
        # copy for misaligned sizes; only taken when numel % 128 != 0.
        z2 = z_flat[:rows * _LANES].reshape(rows, _LANES)
        t2 = t_flat[:rows * _LANES].reshape(rows, _LANES)
    else:
        z2 = z_flat.reshape(rows, _LANES)   # free view: contiguous reshape
        t2 = t_flat.reshape(rows, _LANES)

    # Tile: up to (tile_rows, 128) per buffer per input; keep a multiple of the
    # dtype's sublane tile, clamp down for small inputs.
    tr = max(m, (min(tile_rows, rows) // m) * m)
    n_blocks = pl.cdiv(rows, tr)
    tail_mask = (rows % tr) != 0

    # Grid factoring: prefer an exact divisor <= max_outer; otherwise force a
    # 2-way parallel outer axis (v7x megacore) with one clamped+skipped
    # overshoot block.
    g_outer = 1
    for d in range(min(max_outer, n_blocks), 0, -1):
        if n_blocks % d == 0:
            g_outer = d
            break
    if g_outer == 1 and n_blocks >= 2:
        g_outer = 2
    g_inner = pl.cdiv(n_blocks, g_outer)
    overshoot = g_outer * g_inner - n_blocks

    if overshoot:
        def in_idx(o, i):
            return (jnp.minimum(o * g_inner + i, n_blocks - 1), 0)
    else:
        def in_idx(o, i):
            return (o * g_inner + i, 0)

    kernel = functools.partial(
        _bce_kernel,
        valid_rows=rows,
        n_blocks=n_blocks,
        g_inner=g_inner,
        tile_rows=tr,
        lanes=_LANES,
        tail_mask=tail_mask,
        overshoot_guard=bool(overshoot),
    )

    partials = pl.pallas_call(
        kernel,
        out_shape=jax.ShapeDtypeStruct((g_outer, 8, _LANES), jnp.float32),
        grid_spec=pltpu.PrefetchScalarGridSpec(
            num_scalar_prefetch=0,
            grid=(g_outer, g_inner),
            in_specs=[
                pl.BlockSpec((tr, _LANES), in_idx),
                pl.BlockSpec((tr, _LANES), in_idx),
            ],
            out_specs=pl.BlockSpec((1, 8, _LANES), lambda o, i: (o, 0, 0)),
            scratch_shapes=[pltpu.VMEM((8, _LANES), jnp.float32)],
        ),
        compiler_params=pltpu.CompilerParams(
            dimension_semantics=("parallel", "arbitrary"),
            vmem_limit_bytes=32 * 1024 * 1024,
        ),
    )(z2, t2)

    # PyTorch divides by len(t) == total number of elements.
    return (jnp.sum(partials) + tail) / jnp.float32(total)


def _reference_loss(logit, truth):
    """Plain-JAX reference of the PyTorch module."""
    z = logit.reshape(-1).astype(jnp.float32)
    t = truth.reshape(-1).astype(jnp.float32)
    return jnp.sum(_bce_loss_expr(z, t)) / jnp.float32(z.shape[0])


if __name__ == "__main__":
    key = jax.random.PRNGKey(0)
    k1, k2 = jax.random.split(key)

    # "2d" logits + binary truth maps.
    N, C, H, W = 2, 4, 16, 16
    logit = jax.random.normal(k1, (N, C, H, W), dtype=jnp.float32) * 3.0
    truth = (jax.random.uniform(k2, (N, C, H, W)) > 0.5).astype(jnp.float32)

    loss = jax.block_until_ready(pseudo_bce_loss_2d(logit, truth))
    ref = jax.block_until_ready(_reference_loss(logit, truth))

    assert jnp.allclose(loss, ref, rtol=1e-5, atol=1e-6), (loss, ref)
    print("KERNEL_OK")
</pallas_src>

<mosaic_0001>
module attributes {stable_mosaic.version = 11 : i64} {
  func.func @_bce_kernel(%arg0: i32, %arg1: i32, %arg2: memref<16x128xf32, #tpu.memory_space<vmem>>, %arg3: memref<16x128xf32, #tpu.memory_space<vmem>>, %arg4: memref<1x8x128xf32, #tpu.memory_space<vmem>>, %arg5: memref<8x128xf32, #tpu.memory_space<vmem>>) attributes {dimension_semantics = [#tpu.dimension_semantics<parallel>, #tpu.dimension_semantics<arbitrary>], iteration_bounds = array<i64: 1, 1>, scalar_prefetch = 0 : i64, scratch_operands = 1 : i64, tpu.core_type = #tpu.core_type<tc>, window_params = [{transform_indices = @transform_0, window_bounds = array<i64: 16, 128>}, {transform_indices = @transform_1, window_bounds = array<i64: 16, 128>}, {transform_indices = @transform_2, window_bounds = array<i64: 1, 8, 128>}]} {
    %c0_i32 = arith.constant 0 : i32
    %0 = arith.cmpi eq, %arg1, %c0_i32 : i32
    %1 = arith.extui %0 : i1 to i32
    %c0_i32_0 = arith.constant 0 : i32
    %2 = arith.cmpi ne, %1, %c0_i32_0 : i32
    scf.if %2 {
      %cst_13 = arith.constant 0.000000e+00 : f32
      %25 = vector.broadcast %cst_13 : f32 to vector<8x128xf32>
      %c0_14 = arith.constant 0 : index
      %c0_15 = arith.constant 0 : index
      %26 = vector.load %arg5[%c0_14, %c0_15] : memref<8x128xf32, #tpu.memory_space<vmem>>, vector<8x128xf32>
      tpu.vector_store %arg5[%c0_14, %c0_15], %25 {strides = array<i32>} : memref<8x128xf32, #tpu.memory_space<vmem>>, vector<8x128xf32>,
    } else {
    }
    %c0 = arith.constant 0 : index
    %c0_1 = arith.constant 0 : index
    %3 = vector.load %arg2[%c0, %c0_1] : memref<16x128xf32, #tpu.memory_space<vmem>>, vector<16x128xf32>
    %c0_2 = arith.constant 0 : index
    %c0_3 = arith.constant 0 : index
    %4 = vector.load %arg3[%c0_2, %c0_3] : memref<16x128xf32, #tpu.memory_space<vmem>>, vector<16x128xf32>
    %cst = arith.constant 0.000000e+00 : f32
    %5 = vector.broadcast %cst : f32 to vector<16x128xf32>
    %6 = arith.maximumf %3, %5 : vector<16x128xf32>
    %7 = arith.mulf %3, %4 : vector<16x128xf32>
    %8 = arith.subf %6, %7 : vector<16x128xf32>
    %9 = math.absf %3 : vector<16x128xf32>
    %cst_4 = arith.constant 0.000000e+00 : f32
    %10 = vector.broadcast %cst_4 : f32 to vector<16x128xf32>
    %11 = arith.subf %10, %9 : vector<16x128xf32>
    %12 = math.exp %11 : vector<16x128xf32>
    %cst_5 = arith.constant 1.000000e+00 : f32
    %13 = vector.broadcast %cst_5 : f32 to vector<16x128xf32>
    %14 = arith.addf %13, %12 : vector<16x128xf32>
    %15 = math.log %14 : vector<16x128xf32>
    %16 = arith.addf %8, %15 : vector<16x128xf32>
    %c0_6 = arith.constant 0 : index
    %c0_7 = arith.constant 0 : index
    %17 = vector.load %arg5[%c0_6, %c0_7] : memref<8x128xf32, #tpu.memory_space<vmem>>, vector<8x128xf32>
    %18 = vector.shape_cast %16 : vector<16x128xf32> to vector<2x8x128xf32>
    %cst_8 = arith.constant dense<0.000000e+00> : vector<8x128xf32>
    %19 = vector.multi_reduction <add>, %18, %cst_8 [0] : vector<2x8x128xf32> to vector<8x128xf32>
    %20 = arith.addf %17, %19 : vector<8x128xf32>
    %c0_9 = arith.constant 0 : index
    %c0_10 = arith.constant 0 : index
    %21 = vector.load %arg5[%c0_9, %c0_10] : memref<8x128xf32, #tpu.memory_space<vmem>>, vector<8x128xf32>
    tpu.vector_store %arg5[%c0_9, %c0_10], %20 {strides = array<i32>} : memref<8x128xf32, #tpu.memory_space<vmem>>, vector<8x128xf32>,
    %c0_i32_11 = arith.constant 0 : i32
    %22 = arith.cmpi eq, %arg1, %c0_i32_11 : i32
    %23 = arith.extui %22 : i1 to i32
    %c0_i32_12 = arith.constant 0 : i32
    %24 = arith.cmpi ne, %23, %c0_i32_12 : i32
    scf.if %24 {
      %c0_13 = arith.constant 0 : index
      %c0_14 = arith.constant 0 : index
      %25 = vector.load %arg5[%c0_13, %c0_14] : memref<8x128xf32, #tpu.memory_space<vmem>>, vector<8x128xf32>
      %c0_15 = arith.constant 0 : index
      %c0_16 = arith.constant 0 : index
      %c0_17 = arith.constant 0 : index
      %26 = vector.load %arg4[%c0_15, %c0_16, %c0_17] : memref<1x8x128xf32, #tpu.memory_space<vmem>>, vector<1x8x128xf32>
      %27 = vector.shape_cast %26 : vector<1x8x128xf32> to vector<8x128xf32>
      %28 = vector.shape_cast %25 : vector<8x128xf32> to vector<1x8x128xf32>
      tpu.vector_store %arg4[%c0_15, %c0_16, %c0_17], %28 {strides = array<i32>} : memref<1x8x128xf32, #tpu.memory_space<vmem>>, vector<1x8x128xf32>,
    } else {
    }
    return
  }
  func.func @transform_0(%arg0: i32, %arg1: i32) -> (i32, i32) {
    %c1_i32 = arith.constant 1 : i32
    %0 = arith.muli %arg0, %c1_i32 : i32
    %1 = arith.addi %0, %arg1 : i32
    %c0_i32 = arith.constant 0 : i32
    %c0_i32_0 = arith.constant 0 : i32
    return %1, %c0_i32 : i32, i32
  }
  func.func @transform_1(%arg0: i32, %arg1: i32) -> (i32, i32) {
    %c1_i32 = arith.constant 1 : i32
    %0 = arith.muli %arg0, %c1_i32 : i32
    %1 = arith.addi %0, %arg1 : i32
    %c0_i32 = arith.constant 0 : i32
    %c0_i32_0 = arith.constant 0 : i32
    return %1, %c0_i32 : i32, i32
  }
  func.func @transform_2(%arg0: i32, %arg1: i32) -> (i32, i32, i32) {
    %c0_i32 = arith.constant 0 : i32
    %c0_i32_0 = arith.constant 0 : i32
    %c0_i32_1 = arith.constant 0 : i32
    return %arg0, %c0_i32, %c0_i32_0 : i32, i32, i32
  }
}

</mosaic_0001>

<bundles_post_ra>
// kernel: tpu_custom_call.1
= control target key start
LH: loop header
LB: loop body
LE: loop exit
PB: predicated region body
PF: predicated region fallthrough
CT: control target
= control target key end

     0   :  { %7 = vsyncpa [#allocation4], 0  ;;  %s216_s0 = inlined_call_operand.hbm [shape: f32[16,128], index: 0, kind: input, shape index: {}]   ;;  %s217_s1 = inlined_call_operand.hbm [shape: f32[16,128], index: 1, kind: input, shape index: {}]   ;;  %s218_s2 = inlined_call_operand.hbm [shape: f32[1,8,128], index: 2, kind: output, shape index: {}]  }
   0x1   :  { %8 = vsyncpa [#allocation7], 0 }
   0x2   :  { %9 = vsyncpa [#allocation5], 0  ;;  %s187_s9 = smov [#allocation3]  }
   0x3   :  { %s19_s10 = sshll.u32 %s187_s9, 4  ;;  %s20_s10 = int_to_ptr.vmem [resolvable:$true] %s19_s10 }
   0x4   :  { %s129_s11 = scalar_lea.vmem %s20_s10, 256  ;;  %p134_p1 = scmp.lt.s32.totalorder %s20_s10, %s20_s10 }
   0x5   :  { %p130_p0 = scmp.ne.s32.totalorder %s20_s10, %s129_s11  ;;  %p135_p2 = scmp.lt.s32.totalorder %s129_s11, %s129_s11 }
   0x7   :  { %p136_p3 = por %p135_p2, %p134_p1 }
   0x9   :  { %p137_p4 = pnand %p136_p3, %p130_p0 }
   0xb   :  { %140 = shalt.err (!%p137_p4)
}
   0xc   :  { %s188_s12 = smov 128   ;;  %s189_s13 = smov 8  }
   0xd   :  { %25 = dma.hbm_to_vmem [thread:$0]  %s216_s0, 256, %s20_s10, [#allocation4], %s188_s12, %s188_s12, %s189_s13  }
   0xe   :  { %s190_s16 = smov [#allocation6]  }
   0xf   :  { %s35_s17 = sshll.u32 %s190_s16, 4  ;;  %s36_s17 = int_to_ptr.vmem [resolvable:$true] %s35_s17 }
  0x10   :  { %s149_s18 = scalar_lea.vmem %s36_s17, 256  ;;  %p154_p6 = scmp.lt.s32.totalorder %s36_s17, %s36_s17 }
  0x11   :  { %p150_p5 = scmp.ne.s32.totalorder %s36_s17, %s149_s18  ;;  %p155_p7 = scmp.lt.s32.totalorder %s149_s18, %s149_s18 }
  0x13   :  { %p156_p8 = por %p155_p7, %p154_p6 }
  0x15   :  { %p157_p9 = pnand %p156_p8, %p150_p5 }
  0x17   :  { %160 = shalt.err (!%p157_p9)
}
  0x18   :  { %41 = dma.hbm_to_vmem [thread:$0]  %s217_s1, 256, %s36_s17, [#allocation7], %s188_s12, %s188_s12, %s189_s13  }
  0x19   :  { %181 = dma.done.wait [#allocation4], 256  }
  0x1a   :  { %182 = vsyncadd [#allocation4], 4294967040 }
  0x1b   :  { %183 = dma.done.wait [#allocation7], 256  }
  0x1c   :  { %184 = vsyncadd [#allocation7], 4294967040  ;;  %v57_v0 = vld [vmem:[#allocation3] sm:$0xff]  ;;  %v58_v1 = vld [vmem:[#allocation3 + $0x8] sm:$0xff]  ;;  %s191_s0 = smov [#allocation8]  }
  0x1d   :  { %v67_v2 = vand.u32 2147483647, %v57_v0  ;;  %v68_v3 = vand.u32 2147483647, %v58_v1  ;;  %v59_v12 = vld [vmem:[#allocation6] sm:$0xff]  ;;  %v60_v13 = vld [vmem:[#allocation6 + $0x8] sm:$0xff] }
  0x1e   :  { %v61_v14 = vmax.f32 %v57_v0, 0.0  ;;  %v63_v15 = vmul.f32 %v59_v12, %v57_v0  ;;  %v62_v16 = vmax.f32 %v58_v1, 0.0  ;;  %v64_v17 = vmul.f32 %v60_v13, %v58_v1  ;;  %s98_s1 = sshll.u32 %s191_s0, 4  ;;  %s99_s1 = int_to_ptr.vmem [resolvable:$true] %s98_s1 }
  0x1f   :  { %v69_v4 = vsub.f32 0.0, %v67_v2  ;;  %v70_v5 = vsub.f32 0.0, %v68_v3  ;;  %s161_s21 = scalar_lea.vmem %s99_s1, 128  ;;  %p166_p11 = scmp.lt.s32.totalorder %s99_s1, %s99_s1 }
  0x20   :  { %v65_v18 = vsub.f32 %v61_v14, %v63_v15  ;;  %v66_v20 = vsub.f32 %v62_v16, %v64_v17  ;;  %p162_p10 = scmp.ne.s32.totalorder %s99_s1, %s161_s21  ;;  %p167_p12 = scmp.lt.s32.totalorder %s161_s21, %s161_s21 }
  0x21   :  { %v71_v6 = vmul.f32 1.442695, %v69_v4  ;;  %v73_v7 = vmul.f32 1.442695, %v70_v5 }
  0x22   :  { %p168_p13 = por %p167_p12, %p166_p11 }
  0x23   :  { %113 = vpow2.f32 %v71_v6 }
  0x24   :  { %115 = vpow2.f32 %v73_v7  ;;  %p169_p0 = pnand %p168_p13, %p162_p10 }
  0x30   :  { %v114_v8 = vpop.eup %113 }
  0x31   :  { %v116_v9 = vpop.eup %115  ;;  %v75_v10 = vadd.f32 1.0, %v114_v8 }
  0x32   :  { %v76_v11 = vadd.f32 1.0, %v116_v9 }
  0x33   :  { %117 = vlog2.f32 %v75_v10 }
  0x34   :  { %119 = vlog2.f32 %v76_v11 }
  0x40   :  { %v118_v19 = vpop.eup %117 }
  0x41   :  { %v120_v21 = vpop.eup %119  ;;  %v78_v22 = vmul.f32 0.6931472, %v118_v19 }
  0x42   :  { %v80_v23 = vmul.f32 0.6931472, %v120_v21 }
  0x43   :  { %v81_v24 = vadd.f32 %v78_v22, %v65_v18 }
  0x44   :  { %v82_v25 = vadd.f32 %v80_v23, %v66_v20 }
  0x46   :  { %v84_v26 = vadd.f32 %v82_v25, %v81_v24 }
  0x48   :  { %91 = vst [vmem:[#allocation8] sm:$0xff] %v84_v26 }
  0x49   :  { %172 = shalt.err (!%p169_p0)
}
  0x4a   :  { %101 = dma.vmem_to_hbm [thread:$0]  %s99_s1, 128, %s218_s2, [#allocation5]  }
  0x4b   :  { %185 = dma.done.wait [#allocation5], 128  }
  0x4c   :  { %186 = vsyncadd [#allocation5], 4294967168 }
  0x4d   :  { %105 = vsyncpa [#allocation4], 1 }
  0x4e   :  { %106 = vsyncpa [#allocation7], 1 }
  0x4f   :  { %107 = vsyncpa [#allocation5], 1 }

</bundles_post_ra>
